<compile_context>
chip_gen: v5e
topology: v5e:2x2
jax: 0.10.0
libtpu: 0.0.40
codegen_flags: <defaults>
</compile_context>

<pallas_src>
import functools

import jax
import jax.numpy as jnp
from jax.experimental import pallas as pl
from jax.experimental.pallas import tpu as pltpu

LANE = 128


def _round_up(x, m):
    return ((x + m - 1) // m) * m


def actor_kernel(x_ref, w1_ref, b1_ref, w2_ref, b2_ref, w3_ref, b3_ref,
                 probs_ref):
    # Layer 1: (TB, S) @ (S, 128) + (1, 128) -> ReLU   (bf16 in, f32 acc)
    x = x_ref[...]
    if x.dtype != jnp.bfloat16:
        x = x.astype(jnp.bfloat16)
    h1 = jnp.dot(x, w1_ref[...], preferred_element_type=jnp.float32)
    h1 = jnp.maximum(h1 + b1_ref[...], 0.0)

    # Layer 2: (TB, 128) @ (128, 256) + (1, 256) -> ReLU
    h2 = jnp.dot(h1.astype(jnp.bfloat16), w2_ref[...],
                 preferred_element_type=jnp.float32)
    h2 = jnp.maximum(h2 + b2_ref[...], 0.0)

    # Layer 3: (TB, 256) @ (256, A_pad) + (1, A_pad) -> logits.
    # Padded columns carry a -1e30 bias, so they vanish under softmax.
    logits = jnp.dot(h2.astype(jnp.bfloat16), w3_ref[...],
                     preferred_element_type=jnp.float32)
    logits = logits + b3_ref[...]

    # Numerically stable softmax over the (lane-dense, padded) last axis.
    m = jnp.max(logits, axis=-1, keepdims=True)
    e = jnp.exp(logits - m)
    denom = jnp.sum(e, axis=-1, keepdims=True)
    probs_ref[...] = (e * pl.reciprocal(denom, approx=False)).astype(
        probs_ref.dtype)


def actor_forward_padded(x, params, *, block_b=1024, out_dtype=jnp.float32):
    """Runs the fused MLP. Returns the padded (Bp, A_pad) probability block.

    x: (B, state_size) float32 or bfloat16.
    params: (w1, b1, w2, b2, w3_padded, b3_padded) from init_actor_params.
    """
    w1, b1, w2, b2, w3p, b3p = params
    B, S = x.shape
    A_pad = w3p.shape[1]

    # --- Batch tile: multiple of 8, capped at block_b; pad batch to fit. ---
    TB = min(block_b, _round_up(B, 8))
    if B >= 16:
        # Ensure >= 2 grid steps so both TensorCores are fed on v7x.
        TB = min(TB, _round_up((B + 1) // 2, 8))
    TB = max(8, _round_up(TB, 8))
    Bp = _round_up(B, TB)
    if Bp != B:
        x = jnp.pad(x, ((0, Bp - B), (0, 0)))

    grid = (Bp // TB,)

    # Weights/biases: constant index_map -> stay resident in VMEM across the
    # batch grid; only the x / probs blocks are streamed (double-buffered).
    resident = lambda arr: pl.BlockSpec(arr.shape, lambda i: (0,) * arr.ndim)

    return pl.pallas_call(
        actor_kernel,
        out_shape=jax.ShapeDtypeStruct((Bp, A_pad), out_dtype),
        grid=grid,
        in_specs=[
            pl.BlockSpec((TB, S), lambda i: (i, 0)),   # x: streamed over batch
            resident(w1), resident(b1),
            resident(w2), resident(b2),
            resident(w3p), resident(b3p),
        ],
        out_specs=pl.BlockSpec((TB, A_pad), lambda i: (i, 0)),
        compiler_params=pltpu.CompilerParams(
            dimension_semantics=("parallel",),   # megacore sharding on v7x
            vmem_limit_bytes=32 * 1024 * 1024,   # safe on v7x's 64 MiB VMEM
        ),
    )(x, w1, b1, w2, b2, w3p, b3p)


def actor_forward(x, params, action_size, *, block_b=1024,
                  out_dtype=jnp.float32):
    """Returns (B, action_size) softmax probabilities.

    Prefer jit-wrapping this so the un-padding slice fuses with the consumer;
    or use actor_forward_padded directly to avoid the slice entirely.
    """
    out = actor_forward_padded(x, params, block_b=block_b, out_dtype=out_dtype)
    return out[:x.shape[0], :action_size]


def init_actor_params(key, state_size, action_size):
    """Init mirroring nn.Linear shapes; weights kept as (in, out) in bfloat16.

    Layer-3 weight/bias are padded to a lane-dense 128-column multiple ONCE
    here (pad bias = -1e30), keeping that work out of the forward hot path.
    """
    k1, k2, k3, k4, k5, k6 = jax.random.split(key, 6)

    def linear_init(kw, kb, fan_in, fan_out):
        # PyTorch-default-like bound: U(-1/sqrt(fan_in), 1/sqrt(fan_in))
        bound = 1.0 / jnp.sqrt(fan_in)
        w = jax.random.uniform(kw, (fan_in, fan_out), jnp.float32, -bound, bound)
        b = jax.random.uniform(kb, (1, fan_out), jnp.float32, -bound, bound)
        return w.astype(jnp.bfloat16), b  # bf16 weights, f32 biases

    w1, b1 = linear_init(k1, k2, state_size, 128)
    w2, b2 = linear_init(k3, k4, 128, 256)
    w3, b3 = linear_init(k5, k6, 256, action_size)

    # One-time lane-dense padding of the output layer.
    A_pad = max(LANE, _round_up(action_size, LANE))
    w3p = jnp.zeros((w3.shape[0], A_pad), jnp.bfloat16).at[:, :action_size].set(w3)
    b3p = jnp.full((1, A_pad), -1e30, jnp.float32).at[:, :action_size].set(b3)
    return (w1, b1, w2, b2, w3p, b3p)


def reference_forward(x, params, action_size):
    """Pure-JAX reference using the same bf16 weight / f32 accumulate recipe."""
    w1, b1, w2, b2, w3p, b3p = params
    h1 = jax.nn.relu(jnp.dot(x.astype(jnp.bfloat16), w1,
                             preferred_element_type=jnp.float32) + b1)
    h2 = jax.nn.relu(jnp.dot(h1.astype(jnp.bfloat16), w2,
                             preferred_element_type=jnp.float32) + b2)
    logits = jnp.dot(h2.astype(jnp.bfloat16), w3p,
                     preferred_element_type=jnp.float32) + b3p
    return jax.nn.softmax(logits, axis=-1)[:, :action_size]


if __name__ == "__main__":
    state_size = 32
    action_size = 8

    key = jax.random.PRNGKey(0)
    k_params, k_x1, k_x2 = jax.random.split(key, 3)
    params = init_actor_params(k_params, state_size, action_size)

    fwd = jax.jit(functools.partial(actor_forward, action_size=action_size))

    # Case 1: tiny batch (single grid step).
    batch = 8
    x = jax.random.normal(k_x1, (batch, state_size), jnp.float32)
    probs = jax.block_until_ready(fwd(x, params))
    ref = reference_forward(x, params, action_size)
    assert probs.shape == (batch, action_size)
    assert jnp.allclose(probs, ref, atol=1e-4, rtol=1e-4)
    assert jnp.allclose(jnp.sum(probs, axis=-1), 1.0, atol=1e-4)

    # Case 2: batch that exercises the >=2-step grid (v7x megacore split) and
    # row padding (50 -> Bp=64, TB=32).
    batch2 = 50
    x2 = jax.random.normal(k_x2, (batch2, state_size), jnp.float32)
    probs2 = jax.block_until_ready(fwd(x2, params))
    ref2 = reference_forward(x2, params, action_size)
    assert probs2.shape == (batch2, action_size)
    assert jnp.allclose(probs2, ref2, atol=1e-4, rtol=1e-4)
    assert jnp.allclose(jnp.sum(probs2, axis=-1), 1.0, atol=1e-4)

    print("KERNEL_OK")
</pallas_src>

<mosaic_0001>
module attributes {stable_mosaic.version = 11 : i64} {
  func.func @actor_kernel(%arg0: i32, %arg1: memref<8x32xf32, #tpu.memory_space<vmem>>, %arg2: memref<32x128xbf16, #tpu.memory_space<vmem>>, %arg3: memref<1x128xf32, #tpu.memory_space<vmem>>, %arg4: memref<128x256xbf16, #tpu.memory_space<vmem>>, %arg5: memref<1x256xf32, #tpu.memory_space<vmem>>, %arg6: memref<256x128xbf16, #tpu.memory_space<vmem>>, %arg7: memref<1x128xf32, #tpu.memory_space<vmem>>, %arg8: memref<8x128xf32, #tpu.memory_space<vmem>>) attributes {dimension_semantics = [#tpu.dimension_semantics<parallel>], iteration_bounds = array<i64: 1>, scalar_prefetch = 0 : i64, scratch_operands = 0 : i64, tpu.core_type = #tpu.core_type<tc>, window_params = [{transform_indices = @transform_0, window_bounds = array<i64: 8, 32>}, {pipeline_mode = #tpu.pipeline_mode<synchronous>, transform_indices = @transform_1, window_bounds = array<i64: 32, 128>}, {pipeline_mode = #tpu.pipeline_mode<synchronous>, transform_indices = @transform_2, window_bounds = array<i64: 1, 128>}, {pipeline_mode = #tpu.pipeline_mode<synchronous>, transform_indices = @transform_3, window_bounds = array<i64: 128, 256>}, {pipeline_mode = #tpu.pipeline_mode<synchronous>, transform_indices = @transform_4, window_bounds = array<i64: 1, 256>}, {pipeline_mode = #tpu.pipeline_mode<synchronous>, transform_indices = @transform_5, window_bounds = array<i64: 256, 128>}, {pipeline_mode = #tpu.pipeline_mode<synchronous>, transform_indices = @transform_6, window_bounds = array<i64: 1, 128>}, {transform_indices = @transform_7, window_bounds = array<i64: 8, 128>}]} {
    %c0 = arith.constant 0 : index
    %c0_0 = arith.constant 0 : index
    %0 = vector.load %arg1[%c0, %c0_0] : memref<8x32xf32, #tpu.memory_space<vmem>>, vector<8x32xf32>
    %1 = arith.truncf %0 : vector<8x32xf32> to vector<8x32xbf16>
    %c0_1 = arith.constant 0 : index
    %c0_2 = arith.constant 0 : index
    %2 = vector.load %arg2[%c0_1, %c0_2] : memref<32x128xbf16, #tpu.memory_space<vmem>>, vector<32x128xbf16>
    %cst = arith.constant dense<0.000000e+00> : vector<8x128xf32>
    %3 = tpu.matmul %1, %2, %cst {dimension_numbers = #tpu.dot_dimension_numbers<[1], [0], [0], [1], [0, 0, 1, 1], [], []>} : vector<8x32xbf16>, vector<32x128xbf16>, vector<8x128xf32> -> vector<8x128xf32>
    %c0_3 = arith.constant 0 : index
    %c0_4 = arith.constant 0 : index
    %4 = vector.load %arg3[%c0_3, %c0_4] : memref<1x128xf32, #tpu.memory_space<vmem>>, vector<1x128xf32>
    %5 = vector.broadcast %4 : vector<1x128xf32> to vector<8x128xf32>
    %6 = arith.addf %3, %5 : vector<8x128xf32>
    %cst_5 = arith.constant 0.000000e+00 : f32
    %7 = vector.broadcast %cst_5 : f32 to vector<8x128xf32>
    %8 = arith.maximumf %6, %7 : vector<8x128xf32>
    %9 = arith.truncf %8 : vector<8x128xf32> to vector<8x128xbf16>
    %c0_6 = arith.constant 0 : index
    %c0_7 = arith.constant 0 : index
    %10 = vector.load %arg4[%c0_6, %c0_7] : memref<128x256xbf16, #tpu.memory_space<vmem>>, vector<128x256xbf16>
    %cst_8 = arith.constant dense<0.000000e+00> : vector<8x256xf32>
    %11 = tpu.matmul %9, %10, %cst_8 {dimension_numbers = #tpu.dot_dimension_numbers<[1], [0], [0], [1], [0, 0, 1, 1], [], []>} : vector<8x128xbf16>, vector<128x256xbf16>, vector<8x256xf32> -> vector<8x256xf32>
    %c0_9 = arith.constant 0 : index
    %c0_10 = arith.constant 0 : index
    %12 = vector.load %arg5[%c0_9, %c0_10] : memref<1x256xf32, #tpu.memory_space<vmem>>, vector<1x256xf32>
    %13 = vector.broadcast %12 : vector<1x256xf32> to vector<8x256xf32>
    %14 = arith.addf %11, %13 : vector<8x256xf32>
    %cst_11 = arith.constant 0.000000e+00 : f32
    %15 = vector.broadcast %cst_11 : f32 to vector<8x256xf32>
    %16 = arith.maximumf %14, %15 : vector<8x256xf32>
    %17 = arith.truncf %16 : vector<8x256xf32> to vector<8x256xbf16>
    %c0_12 = arith.constant 0 : index
    %c0_13 = arith.constant 0 : index
    %18 = vector.load %arg6[%c0_12, %c0_13] : memref<256x128xbf16, #tpu.memory_space<vmem>>, vector<256x128xbf16>
    %cst_14 = arith.constant dense<0.000000e+00> : vector<8x128xf32>
    %19 = tpu.matmul %17, %18, %cst_14 {dimension_numbers = #tpu.dot_dimension_numbers<[1], [0], [0], [1], [0, 0, 1, 1], [], []>} : vector<8x256xbf16>, vector<256x128xbf16>, vector<8x128xf32> -> vector<8x128xf32>
    %c0_15 = arith.constant 0 : index
    %c0_16 = arith.constant 0 : index
    %20 = vector.load %arg7[%c0_15, %c0_16] : memref<1x128xf32, #tpu.memory_space<vmem>>, vector<1x128xf32>
    %21 = vector.broadcast %20 : vector<1x128xf32> to vector<8x128xf32>
    %22 = arith.addf %19, %21 : vector<8x128xf32>
    %cst_17 = arith.constant dense<0xFF800000> : vector<8xf32>
    %23 = vector.multi_reduction <maximumf>, %22, %cst_17 [1] : vector<8x128xf32> to vector<8xf32>
    %24 = vector.shape_cast %23 : vector<8xf32> to vector<8x1xf32>
    %25 = vector.broadcast %24 : vector<8x1xf32> to vector<8x128xf32>
    %26 = arith.subf %22, %25 : vector<8x128xf32>
    %27 = math.exp %26 : vector<8x128xf32>
    %cst_18 = arith.constant dense<0.000000e+00> : vector<8xf32>
    %28 = vector.multi_reduction <add>, %27, %cst_18 [1] : vector<8x128xf32> to vector<8xf32>
    %29 = vector.shape_cast %28 : vector<8xf32> to vector<8x1xf32>
    %30 = tpu.reciprocal %29 : vector<8x1xf32> -> vector<8x1xf32>
    %31 = vector.broadcast %30 : vector<8x1xf32> to vector<8x128xf32>
    %32 = arith.mulf %27, %31 : vector<8x128xf32>
    %c0_19 = arith.constant 0 : index
    %c0_20 = arith.constant 0 : index
    %33 = vector.load %arg8[%c0_19, %c0_20] : memref<8x128xf32, #tpu.memory_space<vmem>>, vector<8x128xf32>
    tpu.vector_store %arg8[%c0_19, %c0_20], %32 {strides = array<i32>} : memref<8x128xf32, #tpu.memory_space<vmem>>, vector<8x128xf32>,
    return
  }
  func.func @transform_0(%arg0: i32) -> (i32, i32) {
    %c0_i32 = arith.constant 0 : i32
    %c0_i32_0 = arith.constant 0 : i32
    return %arg0, %c0_i32 : i32, i32
  }
  func.func @transform_1(%arg0: i32) -> (i32, i32) {
    %c0_i32 = arith.constant 0 : i32
    %c0_i32_0 = arith.constant 0 : i32
    %c0_i32_1 = arith.constant 0 : i32
    return %c0_i32, %c0_i32_0 : i32, i32
  }
  func.func @transform_2(%arg0: i32) -> (i32, i32) {
    %c0_i32 = arith.constant 0 : i32
    %c0_i32_0 = arith.constant 0 : i32
    %c0_i32_1 = arith.constant 0 : i32
    return %c0_i32, %c0_i32_0 : i32, i32
  }
  func.func @transform_3(%arg0: i32) -> (i32, i32) {
    %c0_i32 = arith.constant 0 : i32
    %c0_i32_0 = arith.constant 0 : i32
    %c0_i32_1 = arith.constant 0 : i32
    return %c0_i32, %c0_i32_0 : i32, i32
  }
  func.func @transform_4(%arg0: i32) -> (i32, i32) {
    %c0_i32 = arith.constant 0 : i32
    %c0_i32_0 = arith.constant 0 : i32
    %c0_i32_1 = arith.constant 0 : i32
    return %c0_i32, %c0_i32_0 : i32, i32
  }
  func.func @transform_5(%arg0: i32) -> (i32, i32) {
    %c0_i32 = arith.constant 0 : i32
    %c0_i32_0 = arith.constant 0 : i32
    %c0_i32_1 = arith.constant 0 : i32
    return %c0_i32, %c0_i32_0 : i32, i32
  }
  func.func @transform_6(%arg0: i32) -> (i32, i32) {
    %c0_i32 = arith.constant 0 : i32
    %c0_i32_0 = arith.constant 0 : i32
    %c0_i32_1 = arith.constant 0 : i32
    return %c0_i32, %c0_i32_0 : i32, i32
  }
  func.func @transform_7(%arg0: i32) -> (i32, i32) {
    %c0_i32 = arith.constant 0 : i32
    %c0_i32_0 = arith.constant 0 : i32
    return %arg0, %c0_i32 : i32, i32
  }
}

</mosaic_0001>

<bundles_post_ra>
// kernel: actor_forward.1
= control target key start
LH: loop header
LB: loop body
LE: loop exit
PB: predicated region body
PF: predicated region fallthrough
CT: control target
= control target key end

     0   :  { %12 = vsyncpa [#allocation3], 0  ;;  %s849_s0 = inlined_call_operand.hbm [shape: f32[8,32], index: 0, kind: input, shape index: {}]   ;;  %s850_s1 = inlined_call_operand.hbm [shape: bf16[32,128], index: 1, kind: input, shape index: {}]   ;;  %s851_s2 = inlined_call_operand.vmem [shape: f32[1,128], index: 2, kind: input, shape index: {}]   ;;  %s852_s3 = inlined_call_operand.hbm [shape: bf16[128,256], index: 3, kind: input, shape index: {}]   ;;  %s853_s4 = inlined_call_operand.vmem [shape: f32[1,256], index: 4, kind: input, shape index: {}]   ;;  %s854_s5 = inlined_call_operand.hbm [shape: bf16[256,128], index: 5, kind: input, shape index: {}]   ;;  %s855_s6 = inlined_call_operand.vmem [shape: f32[1,128], index: 6, kind: input, shape index: {}]   ;;  %s856_s7 = inlined_call_operand.hbm [shape: f32[8,128], index: 7, kind: output, shape index: {}]  }
   0x1   :  { %13 = vsyncpa [#allocation6], 0 }
   0x2   :  { %14 = vsyncpa [#allocation9], 0  ;;  %s31_s26 = sshll.u32 %s850_s1, 4  ;;  %s32_s26 = int_to_ptr.hbm [resolvable:$true] %s31_s26 }
   0x3   :  { %15 = vsyncpa [#allocation4], 0  ;;  %s776_s27 = smov [#allocation5]   ;;  %s21_s8 = sshll.u32 %s849_s0, 4  ;;  %s22_s8 = int_to_ptr.hbm [resolvable:$true] %s21_s8 }
   0x4   :  { %s33_s28 = sshll.u32 %s776_s27, 4  ;;  %s777_s9 = smov 64   ;;  %s34_s28 = int_to_ptr.vmem [resolvable:$true] %s33_s28 }
   0x5   :  { %s778_s10 = smov 4   ;;  %s779_s11 = smov [#allocation2]  }
   0x6   :  { %39 = dma.hbm_to_vmem [thread:$0]  %s32_s26, 256, %s34_s28, [#allocation6], %s777_s9, %s777_s9, %s778_s10  }
   0x7   :  { %s23_s12 = sshll.u32 %s779_s11, 4  ;;  %s46_s15 = sshll.u32 %s852_s3, 4  ;;  %s24_s12 = int_to_ptr.vmem [resolvable:$true] %s23_s12  ;;  %s47_s15 = int_to_ptr.hbm [resolvable:$true] %s46_s15 }
   0x8   :  { %26 = dma.hbm_to_vmem [thread:$0]  %s22_s8, 128, %s24_s12, [#allocation3]  }
   0x9   :  { %s780_s1 = smov [#allocation7]   ;;  %s61_s0 = sshll.u32 %s854_s5, 4  ;;  %s62_s0 = int_to_ptr.hbm [resolvable:$true] %s61_s0 }
   0xa   :  { %s48_s16 = sshll.u32 %s780_s1, 4  ;;  %s781_s19 = smov 128   ;;  %s49_s16 = int_to_ptr.vmem [resolvable:$true] %s48_s16 }
   0xb   :  { %s782_s20 = smov 8   ;;  %s783_s21 = smov [#allocation8]  }
   0xc   :  { %54 = dma.hbm_to_vmem [thread:$0]  %s47_s15, 2048, %s49_s16, [#allocation6], %s781_s19, %s781_s19, %s782_s20  }
   0xd   :  { %s63_s22 = sshll.u32 %s783_s21, 4  ;;  %s64_s22 = int_to_ptr.vmem [resolvable:$true] %s63_s22 }
   0xe   :  { %69 = dma.hbm_to_vmem [thread:$0]  %s62_s0, 2048, %s64_s22, [#allocation9], %s777_s9, %s777_s9, %s778_s10  }
   0xf   :  { %768 = dma.done.wait [#allocation3], 128  }
  0x10   :  { %769 = vsyncadd [#allocation3], 4294967168 }
  0x11   :  { %770 = dma.done.wait [#allocation6], 2304  }
  0x12   :  { %771 = vsyncadd [#allocation6], 4294964992 }
  0x13   :  { %772 = dma.done.wait [#allocation9], 2048  }
  0x14   :  { %773 = vsyncadd [#allocation9], 4294965248  ;;  %v600_v0 = vld [vmem:[#allocation5 + $0x8] sm:$0xff]  ;;  %v599_v1 = vld [vmem:[#allocation5] sm:$0xff]  ;;  %vm111_vm0 = vcmask 261120   ;;  %s450_s28 = sshll.u32 %s856_s7, 4  ;;  %s451_s28 = int_to_ptr.hbm [resolvable:$true] %s450_s28 }
  0x15   :  { %v89_v2 = vld [vmem:[#allocation2] sm:$0xff]  ;;  %v529_v3 = vld [vmem:[#allocation7 + $0x70] sm:$0xf]  ;;  %v616_v4 = vld [vmem:[#allocation7 + $0x74] sm:$0xf0]  ;;  %121 = vmatpush.bf16.msra.mxu0 %v600_v0 }
  0x16   :  { %v615_v5 = vld [vmem:[#allocation7 + $0x74] sm:$0xf]  ;;  %v530_v6 = vor.u32 %v616_v4, %v529_v3  ;;  %v531_v7 = vld [vmem:[#allocation7 + $0x78] sm:$0xf0]  ;;  %v521_v8 = vld [vmem:[#allocation7 + $0x60] sm:$0xf]  ;;  %v90_v14 = vpack.c.bf16 %v89_v2, %v89_v2 }
  0x17   :  { %v614_v9 = vld [vmem:[#allocation7 + $0x64] sm:$0xf0]  ;;  %v534_v10 = vor.u32 %v615_v5, %v531_v7  ;;  %v613_v11 = vld [vmem:[#allocation7 + $0x64] sm:$0xf]  ;;  %v523_v12 = vld [vmem:[#allocation7 + $0x68] sm:$0xf0] }
  0x18   :  { %232 = vmatpush.bf16.msra.mxu1 %v530_v6  ;;  %v522_v13 = vor.u32 %v614_v9, %v521_v8  ;;  %v526_v15 = vor.u32 %v613_v11, %v523_v12  ;;  %v513_v16 = vld [vmem:[#allocation7 + $0x50] sm:$0xf]  ;;  %v612_v17 = vld [vmem:[#allocation7 + $0x54] sm:$0xf0]  ;;  %v611_v18 = vld [vmem:[#allocation7 + $0x54] sm:$0xf] }
  0x19   :  { %245 = vmatpush.bf16.msra.mxu2 %v534_v10  ;;  %122 = vmatpush.bf16.msra.mxu0 %v599_v1  ;;  %v515_v19 = vld [vmem:[#allocation7 + $0x58] sm:$0xf0]  ;;  %v514_v20 = vor.u32 %v612_v17, %v513_v16  ;;  %v505_v21 = vld [vmem:[#allocation7 + $0x40] sm:$0xf]  ;;  %v610_v23 = vld [vmem:[#allocation7 + $0x44] sm:$0xf0] }
  0x1a   :  { %v518_v22 = vor.u32 %v611_v18, %v515_v19  ;;  %v609_v24 = vld [vmem:[#allocation7 + $0x44] sm:$0xf]  ;;  %v507_v25 = vld [vmem:[#allocation7 + $0x48] sm:$0xf0]  ;;  %v506_v26 = vor.u32 %v610_v23, %v505_v21  ;;  %v497_v28 = vld [vmem:[#allocation7 + $0x30] sm:$0xf] }
  0x1b   :  { %v510_v27 = vor.u32 %v609_v24, %v507_v25  ;;  %v608_v29 = vld [vmem:[#allocation7 + $0x34] sm:$0xf0]  ;;  %v607_v30 = vld [vmem:[#allocation7 + $0x34] sm:$0xf]  ;;  %v499_v31 = vld [vmem:[#allocation7 + $0x38] sm:$0xf0] }
  0x1c   :  { %233 = vmatpush.bf16.msra.mxu1 %v522_v13  ;;  %470 = vmatmul.msk.bf16.vlgmr.msra.gmra.mxu0 %vm111_vm0, %v90_v14  ;;  %v498_v32 = vor.u32 %v608_v29, %v497_v28  ;;  %v502_v33 = vor.u32 %v607_v30, %v499_v31  ;;  %v489_v34 = vld [vmem:[#allocation7 + $0x20] sm:$0xf]  ;;  %v606_v35 = vld [vmem:[#allocation7 + $0x24] sm:$0xf0]  ;;  %v605_v36 = vld [vmem:[#allocation7 + $0x24] sm:$0xf] }
  0x1d   :  { %246 = vmatpush.bf16.msra.mxu2 %v526_v15  ;;  %v491_v37 = vld [vmem:[#allocation7 + $0x28] sm:$0xf0]  ;;  %v490_v38 = vor.u32 %v606_v35, %v489_v34  ;;  %v481_v40 = vld [vmem:[#allocation7 + $0x10] sm:$0xf]  ;;  %v604_v41 = vld [vmem:[#allocation7 + $0x14] sm:$0xf0] }
  0x1e   :  { %v494_v39 = vor.u32 %v605_v36, %v491_v37  ;;  %v603_v42 = vld [vmem:[#allocation7 + $0x14] sm:$0xf]  ;;  %v482_v43 = vor.u32 %v604_v41, %v481_v40  ;;  %v483_v44 = vld [vmem:[#allocation7 + $0x18] sm:$0xf0]  ;;  %v473_v46 = vld [vmem:[#allocation7] sm:$0xf] }
  0x1f   :  { %v486_v45 = vor.u32 %v603_v42, %v483_v44  ;;  %v602_v47 = vld [vmem:[#allocation7 + $0x4] sm:$0xf0]  ;;  %v601_v48 = vld [vmem:[#allocation7 + $0x4] sm:$0xf]  ;;  %v475_v50 = vld [vmem:[#allocation7 + $0x8] sm:$0xf0] }
  0x20   :  { %234 = vmatpush.bf16.msra.mxu1 %v514_v20  ;;  %v474_v49 = vor.u32 %v602_v47, %v473_v46  ;;  %v478_v51 = vor.u32 %v601_v48, %v475_v50  ;;  %v624_v52 = vld [vmem:[#allocation8 + $0x38] sm:$0xff]  ;;  %v623_v54 = vld [vmem:[#allocation8 + $0x30] sm:$0xff]  ;;  %v622_v56 = vld [vmem:[#allocation8 + $0x28] sm:$0xff] }
  0x21   :  { %247 = vmatpush.bf16.msra.mxu2 %v518_v22  ;;  %v632_v53 = vld [vmem:[#allocation8 + $0x78] sm:$0xff]  ;;  %394 = vmatpush.bf16.msra.mxu3 %v624_v52  ;;  %v631_v55 = vld [vmem:[#allocation8 + $0x70] sm:$0xff]  ;;  %v630_v57 = vld [vmem:[#allocation8 + $0x68] sm:$0xff] }
  0x22   :  { %407 = vmatpush.bf16.msrb.mxu0 %v632_v53  ;;  %v621_v58 = vld [vmem:[#allocation8 + $0x20] sm:$0xff]  ;;  %v620_v60 = vld [vmem:[#allocation8 + $0x18] sm:$0xff]  ;;  %v619_v62 = vld [vmem:[#allocation8 + $0x10] sm:$0xff] }
  0x23   :  { %v629_v59 = vld [vmem:[#allocation8 + $0x60] sm:$0xff]  ;;  %v628_v61 = vld [vmem:[#allocation8 + $0x58] sm:$0xff]  ;;  %v642_v63 = vld [vmem:[%s851_s2] ss:$0 sm:$0xff] }
  0x24   :  { %235 = vmatpush.bf16.msra.mxu1 %v506_v26  ;;  %v618_v5 = vld [vmem:[#allocation8 + $0x8] sm:$0xff]  ;;  %v627_v6 = vld [vmem:[#allocation8 + $0x50] sm:$0xff]  ;;  %v617_v7 = vld [vmem:[#allocation8] sm:$0xff] }
  0x25   :  { %248 = vmatpush.bf16.msra.mxu2 %v510_v27  ;;  %395 = vmatpush.bf16.msra.mxu3 %v623_v54  ;;  %v626_v8 = vld [vmem:[#allocation8 + $0x48] sm:$0xff]  ;;  %v625_v9 = vld [vmem:[#allocation8 + $0x40] sm:$0xff] }
  0x26   :  { %408 = vmatpush.bf16.msrb.mxu0 %v631_v55  ;;  %v146_v10 = vld [vmem:[%s853_s4] sm:$0x3]  ;;  %s784_s4 = smov [#allocation10]  }
  0x27   :  { %v148_v11 = vperm.slane %v146_v10, 0  ;;  %v149_v15 = vperm.slane %v146_v10, 1  ;;  %v643_v23 = vld [vmem:[%s855_s6] ss:$0 sm:$0xff]  ;;  %s448_s6 = sshll.u32 %s784_s4, 4  ;;  %s449_s6 = int_to_ptr.vmem [resolvable:$true] %s448_s6 }
  0x28   :  { %236 = vmatpush.bf16.msra.mxu1 %v498_v32 }
  0x29   :  { %249 = vmatpush.bf16.msra.mxu2 %v502_v33  ;;  %396 = vmatpush.bf16.msra.mxu3 %v622_v56 }
  0x2a   :  { %409 = vmatpush.bf16.msrb.mxu0 %v630_v57 }
  0x2c   :  { %237 = vmatpush.bf16.msra.mxu1 %v490_v38 }
  0x2d   :  { %250 = vmatpush.bf16.msra.mxu2 %v494_v39  ;;  %397 = vmatpush.bf16.msra.mxu3 %v621_v58 }
  0x2e   :  { %410 = vmatpush.bf16.msrb.mxu0 %v629_v59 }
  0x30   :  { %238 = vmatpush.bf16.msra.mxu1 %v482_v43 }
  0x31   :  { %251 = vmatpush.bf16.msra.mxu2 %v486_v45  ;;  %398 = vmatpush.bf16.msra.mxu3 %v620_v60 }
  0x32   :  { %411 = vmatpush.bf16.msrb.mxu0 %v628_v61 }
  0x34   :  { %239 = vmatpush.bf16.msra.mxu1 %v474_v49 }
  0x35   :  { %252 = vmatpush.bf16.msra.mxu2 %v478_v51  ;;  %399 = vmatpush.bf16.msra.mxu3 %v619_v62 }
  0x36   :  { %412 = vmatpush.bf16.msrb.mxu0 %v627_v6 }
  0x39   :  { %400 = vmatpush.bf16.msra.mxu3 %v618_v5 }
  0x3a   :  { %413 = vmatpush.bf16.msrb.mxu0 %v626_v8 }
  0x3d   :  { %401 = vmatpush.bf16.msra.mxu3 %v617_v7 }
  0x3e   :  { %414 = vmatpush.bf16.msrb.mxu0 %v625_v9 }
  0x99   :  { %v124_v0 = vpop.f32.mrf.mxu0 }
  0x9a   :  { %v125_v1 = vadd.f32 %v642_v63, %v124_v0 }
  0x9c   :  { %v128_v2 = vmax.f32 %v125_v1, 0.0 }
  0x9e   :  { %v129_v3 = vpack.c.bf16 %v128_v2, %v128_v2 }
  0xa0   :  { %240 = vmatmul.bf16.vlgmr.msra.gmra.mxu1 %v129_v3  ;;  %253 = vmatmul.bf16.vlgmr.msra.gmra.mxu2 %v129_v3 }
  0xa1   :  { %v126_v4 = vpop.f32.mrf.mxu0 }
 0x11d   :  { %v241_v12 = vpop.f32.mrf.mxu1 }
 0x11e   :  { %v242_v13 = vadd.f32 %v241_v12, %v148_v11 }
 0x120   :  { %v258_v14 = vmax.f32 %v242_v13, 0.0 }
 0x122   :  { %v260_v16 = vpack.c.bf16 %v258_v14, %v258_v14 }
 0x123   :  { %v254_v17 = vpop.f32.mrf.mxu2 }
 0x124   :  { %v255_v18 = vadd.f32 %v254_v17, %v149_v15  ;;  %402 = vmatmul.bf16.vlgmr.msra.gmra.mxu3 %v260_v16 }
 0x125   :  { %v243_v19 = vpop.f32.mrf.mxu1 }
 0x126   :  { %v259_v20 = vmax.f32 %v255_v18, 0.0 }
 0x128   :  { %v261_v21 = vpack.c.bf16 %v259_v20, %v259_v20 }
 0x12a   :  { %415 = vmatmul.bf16.vlgmr.msrb.gmra.mxu0 %v261_v21 }
 0x12b   :  { %v256_v22 = vpop.f32.mrf.mxu2 }
 0x1a7   :  { %v403_v24 = vpop.f32.mrf.mxu3  ;;  %v416_v25 = vpop.f32.mrf.mxu0 }
 0x1a8   :  { %v404_v26 = vadd.f32 %v643_v23, %v403_v24 }
 0x1aa   :  { %v417_v27 = vadd.f32 %v416_v25, %v404_v26 }
 0x1ac   :  { %420 = vmax.xlane.f32.xlu0 %v417_v27 }
 0x1af   :  { %v405_v28 = vpop.f32.mrf.mxu3  ;;  %v418_v29 = vpop.f32.mrf.mxu0 }
 0x21f   :  { %v421_v30 = vpop.xlane.xlu0 %420 }
 0x220   :  { %v422_v31 = vsub.f32 %v417_v27, %v421_v30 }
 0x222   :  { %v423_v32 = vmul.f32 1.442695, %v422_v31 }
 0x224   :  { %644 = vpow2.f32 %v423_v32 }
 0x22a   :  { %v645_v33 = vpop.eup %644 }
 0x22b   :  { %425 = vadd.xlane.f32.xlu0 %v645_v33 }
 0x29e   :  { %v426_v34 = vpop.xlane.xlu0 %425 }
 0x29f   :  { %646 = vrcp.f32 %v426_v34  ;;  %v438_v38 = vand.u32 2147483648, %v426_v34  ;;  %v436_v40 = vand.u32 2147483647, %v426_v34  ;;  %vm432_vm2 = vweird.f32 %v426_v34 }
 0x2a1   :  { %v439_v42 = vor.u32 1.1754944e-38, %v438_v38  ;;  %vm437_vm4 = vcmp.eq.f32.partialorder %v436_v40, 8.507059e+37 }
 0x2a5   :  { %v647_v35 = vpop.eup %646 }
 0x2a6   :  { %v428_v36 = vmul.f32 %v647_v35, %v426_v34  ;;  %vm433_vm1 = vweird.f32 %v647_v35 }
 0x2a7   :  { %vm434_vm3 = vmor %vm432_vm2, %vm433_vm1 }
 0x2a8   :  { %v429_v37 = vsub.f32 1.0, %v428_v36 }
 0x2aa   :  { %v430_v39 = vmul.f32 %v647_v35, %v429_v37 }
 0x2ac   :  { %v431_v41 = vadd.f32 %v647_v35, %v430_v39 }
 0x2ae   :  { %v435_v43 = vsel %vm434_vm3, %v647_v35, %v431_v41 }
 0x2af   :  { %v440_v44 = vsel %vm437_vm4, %v439_v42, %v435_v43 }
 0x2b0   :  { %v441_v45 = vmul.f32 %v645_v33, %v440_v44 }
 0x2b2   :  { %442 = vst [vmem:[#allocation10] sm:$0xff] %v441_v45 }
 0x2b3   :  { %453 = dma.vmem_to_hbm [thread:$0]  %s449_s6, 128, %s451_s28, [#allocation4]  }
 0x2b4   :  { %774 = dma.done.wait [#allocation4], 128  }
 0x2b5   :  { %775 = vsyncadd [#allocation4], 4294967168 }
 0x2b6   :  { %458 = vsyncpa [#allocation3], 1 }
 0x2b7   :  { %459 = vsyncpa [#allocation6], 1 }
 0x2b8   :  { %460 = vsyncpa [#allocation9], 1 }
 0x2b9   :  { %461 = vsyncpa [#allocation4], 1 }

</bundles_post_ra>
